<compile_context>
chip_gen: v7x
topology: tpu7x:2x2x1
jax: 0.10.0
libtpu: 0.0.40
codegen_flags: <defaults>
</compile_context>

<pallas_src>
import jax
import jax.numpy as jnp
from jax.experimental import pallas as pl
from jax.experimental.pallas import tpu as pltpu


def _round_up(x, m):
    return ((x + m - 1) // m) * m


def _myloss_kernel(x_ref, r_ref, m_ref, o_ref):
    """One (TB, N) tile: masked |x-r| row means, accumulated into an SMEM scalar."""
    # Init this split's accumulator on its first tile of the reduction axis.
    @pl.when(pl.program_id(1) == 0)
    def _():
        o_ref[0, 0] = jnp.float32(0.0)

    x = x_ref[...]
    r = r_ref[...]
    m = m_ref[...]
    if x.dtype != jnp.float32:
        x = x.astype(jnp.float32)
    if r.dtype != jnp.float32:
        r = r.astype(jnp.float32)
    if m.dtype != jnp.float32:
        m = m.astype(jnp.float32)

    elem = jnp.abs(x - r) * m                        # VPU
    num = jnp.sum(elem, axis=1, keepdims=True)       # XLU lane reduce, (TB, 1)
    den = jnp.sum(m, axis=1, keepdims=True)          # XLU lane reduce, (TB, 1)
    per_row = num * pl.reciprocal(den)               # exact reciprocal
    # TODO(synk): a fully-zero mask row gives den=0 -> inf/NaN, matching the
    # PyTorch reference semantics (no guard there either).
    o_ref[0, 0] += jnp.sum(per_row)


def my_loss(inputs, rank, rank_mask, *, tile_b=512, num_partials=2):
    B, N = inputs.shape

    # Tile budgeting: 3 f32 inputs x 2 pipeline buffers per tile <= ~12 MiB.
    vmem_budget_bytes = 12 * 1024 * 1024
    max_tile_elems = vmem_budget_bytes // (3 * 2 * 4)
    tb_cap = max(8, (max_tile_elems // max(N, 1)) // 8 * 8)
    tb = min(tile_b, tb_cap, _round_up(B, 8))
    tb = max(8, (tb // 8) * 8)

    n_tiles = pl.cdiv(B, tb)
    num_partials = max(1, min(num_partials, n_tiles))
    n_tiles_padded = _round_up(n_tiles, num_partials)
    tiles_per_split = n_tiles_padded // num_partials
    padded_b = n_tiles_padded * tb

    pad = padded_b - B
    if pad:
        inputs = jnp.pad(inputs, ((0, pad), (0, 0)))
        rank = jnp.pad(rank, ((0, pad), (0, 0)))
        # All-ones padded mask rows: den = N > 0 and num = 0 -> contributes 0.
        rank_mask = jnp.pad(rank_mask, ((0, pad), (0, 0)), constant_values=1.0)

    in_map = lambda s, t: (s * tiles_per_split + t, 0)

    partials = pl.pallas_call(
        _myloss_kernel,
        out_shape=jax.ShapeDtypeStruct((num_partials, 1), jnp.float32),
        grid_spec=pltpu.PrefetchScalarGridSpec(
            num_scalar_prefetch=0,
            grid=(num_partials, tiles_per_split),
            in_specs=[
                pl.BlockSpec((tb, N), in_map),
                pl.BlockSpec((tb, N), in_map),
                pl.BlockSpec((tb, N), in_map),
            ],
            out_specs=pl.BlockSpec(
                (1, 1), lambda s, t: (s, 0), memory_space=pltpu.SMEM
            ),
        ),
        compiler_params=pltpu.CompilerParams(
            dimension_semantics=("parallel", "arbitrary")
        ),
    )(inputs, rank, rank_mask)

    # Combine the per-split partial sums and normalize by the true batch size.
    return jnp.sum(partials) * jnp.float32(1.0 / B)


if __name__ == "__main__":
    key = jax.random.PRNGKey(0)
    k1, k2, k3, k4, k5, k6 = jax.random.split(key, 6)

    def ref_loss(x, r, m):
        return jnp.mean(jnp.sum(jnp.abs(x - r) * m, axis=1) / jnp.sum(m, axis=1))

    # Small lane-aligned shape (matches the module's expected layout).
    B, N = 8, 128
    inputs = jax.random.normal(k1, (B, N), dtype=jnp.float32)
    rank = jax.random.normal(k2, (B, N), dtype=jnp.float32)
    rank_mask = (jax.random.uniform(k3, (B, N)) > 0.5).astype(jnp.float32)
    rank_mask = rank_mask.at[:, 0].set(1.0)  # guarantee non-empty rows

    loss = my_loss(inputs, rank, rank_mask)
    jax.block_until_ready(loss)
    assert jnp.allclose(loss, ref_loss(inputs, rank, rank_mask), rtol=1e-5, atol=1e-5), (
        loss, ref_loss(inputs, rank, rank_mask))

    # Shape that exercises batch tiling, row padding and the 2-way partial split.
    B2, N2 = 300, 256
    x2 = jax.random.normal(k4, (B2, N2), dtype=jnp.float32)
    r2 = jax.random.normal(k5, (B2, N2), dtype=jnp.float32)
    m2 = (jax.random.uniform(k6, (B2, N2)) > 0.5).astype(jnp.float32)
    m2 = m2.at[:, 0].set(1.0)
    loss2 = my_loss(x2, r2, m2, tile_b=64, num_partials=2)
    jax.block_until_ready(loss2)
    assert jnp.allclose(loss2, ref_loss(x2, r2, m2), rtol=1e-5, atol=1e-5), (
        loss2, ref_loss(x2, r2, m2))

    print("KERNEL_OK")
</pallas_src>

<mosaic_0001>
module attributes {stable_mosaic.version = 11 : i64} {
  func.func @_myloss_kernel(%arg0: i32, %arg1: i32, %arg2: memref<8x128xf32, #tpu.memory_space<vmem>>, %arg3: memref<8x128xf32, #tpu.memory_space<vmem>>, %arg4: memref<8x128xf32, #tpu.memory_space<vmem>>, %arg5: memref<1x1xf32, #tpu.memory_space<smem>>) attributes {dimension_semantics = [#tpu.dimension_semantics<parallel>, #tpu.dimension_semantics<arbitrary>], iteration_bounds = array<i64: 1, 1>, scalar_prefetch = 0 : i64, scratch_operands = 0 : i64, tpu.core_type = #tpu.core_type<tc>, window_params = [{transform_indices = @transform_0, window_bounds = array<i64: 8, 128>}, {transform_indices = @transform_1, window_bounds = array<i64: 8, 128>}, {transform_indices = @transform_2, window_bounds = array<i64: 8, 128>}, {transform_indices = @transform_3, window_bounds = array<i64: 1, 1>}]} {
    %c0_i32 = arith.constant 0 : i32
    %0 = arith.cmpi eq, %arg1, %c0_i32 : i32
    %1 = arith.extui %0 : i1 to i32
    %c0_i32_0 = arith.constant 0 : i32
    %2 = arith.cmpi ne, %1, %c0_i32_0 : i32
    scf.if %2 {
      %cst_12 = arith.constant 0.000000e+00 : f32
      %c0_13 = arith.constant 0 : index
      %c0_14 = arith.constant 0 : index
      %22 = memref.load %arg5[%c0_13, %c0_14] : memref<1x1xf32, #tpu.memory_space<smem>>
      memref.store %cst_12, %arg5[%c0_13, %c0_14] : memref<1x1xf32, #tpu.memory_space<smem>>
    } else {
    }
    %c0 = arith.constant 0 : index
    %c0_1 = arith.constant 0 : index
    %3 = vector.load %arg2[%c0, %c0_1] : memref<8x128xf32, #tpu.memory_space<vmem>>, vector<8x128xf32>
    %c0_2 = arith.constant 0 : index
    %c0_3 = arith.constant 0 : index
    %4 = vector.load %arg3[%c0_2, %c0_3] : memref<8x128xf32, #tpu.memory_space<vmem>>, vector<8x128xf32>
    %c0_4 = arith.constant 0 : index
    %c0_5 = arith.constant 0 : index
    %5 = vector.load %arg4[%c0_4, %c0_5] : memref<8x128xf32, #tpu.memory_space<vmem>>, vector<8x128xf32>
    %6 = arith.subf %3, %4 : vector<8x128xf32>
    %7 = math.absf %6 : vector<8x128xf32>
    %8 = arith.mulf %7, %5 : vector<8x128xf32>
    %cst = arith.constant dense<0.000000e+00> : vector<8xf32>
    %9 = vector.multi_reduction <add>, %8, %cst [1] : vector<8x128xf32> to vector<8xf32>
    %10 = vector.shape_cast %9 : vector<8xf32> to vector<8x1xf32>
    %cst_6 = arith.constant dense<0.000000e+00> : vector<8xf32>
    %11 = vector.multi_reduction <add>, %5, %cst_6 [1] : vector<8x128xf32> to vector<8xf32>
    %12 = vector.shape_cast %11 : vector<8xf32> to vector<8x1xf32>
    %13 = tpu.reciprocal %12 : vector<8x1xf32> -> vector<8x1xf32>
    %14 = arith.mulf %10, %13 : vector<8x1xf32>
    %c0_7 = arith.constant 0 : index
    %c0_8 = arith.constant 0 : index
    %15 = memref.load %arg5[%c0_7, %c0_8] : memref<1x1xf32, #tpu.memory_space<smem>>
    %16 = vector.shape_cast %14 : vector<8x1xf32> to vector<1x8x1xf32>
    %cst_9 = arith.constant dense<0.000000e+00> : vector<1xf32>
    %17 = vector.multi_reduction <add>, %16, %cst_9 [1, 2] : vector<1x8x1xf32> to vector<1xf32>
    %18 = vector.shape_cast %17 : vector<1xf32> to vector<1x1x1xf32>
    %19 = vector.extract %18[0, 0, 0] : f32 from vector<1x1x1xf32>
    %20 = arith.addf %15, %19 : f32
    %c0_10 = arith.constant 0 : index
    %c0_11 = arith.constant 0 : index
    %21 = memref.load %arg5[%c0_10, %c0_11] : memref<1x1xf32, #tpu.memory_space<smem>>
    memref.store %20, %arg5[%c0_10, %c0_11] : memref<1x1xf32, #tpu.memory_space<smem>>
    return
  }
  func.func @transform_0(%arg0: i32, %arg1: i32) -> (i32, i32) {
    %c1_i32 = arith.constant 1 : i32
    %0 = arith.muli %arg0, %c1_i32 : i32
    %1 = arith.addi %0, %arg1 : i32
    %c0_i32 = arith.constant 0 : i32
    %c0_i32_0 = arith.constant 0 : i32
    return %1, %c0_i32 : i32, i32
  }
  func.func @transform_1(%arg0: i32, %arg1: i32) -> (i32, i32) {
    %c1_i32 = arith.constant 1 : i32
    %0 = arith.muli %arg0, %c1_i32 : i32
    %1 = arith.addi %0, %arg1 : i32
    %c0_i32 = arith.constant 0 : i32
    %c0_i32_0 = arith.constant 0 : i32
    return %1, %c0_i32 : i32, i32
  }
  func.func @transform_2(%arg0: i32, %arg1: i32) -> (i32, i32) {
    %c1_i32 = arith.constant 1 : i32
    %0 = arith.muli %arg0, %c1_i32 : i32
    %1 = arith.addi %0, %arg1 : i32
    %c0_i32 = arith.constant 0 : i32
    %c0_i32_0 = arith.constant 0 : i32
    return %1, %c0_i32 : i32, i32
  }
  func.func @transform_3(%arg0: i32, %arg1: i32) -> (i32, i32) {
    %c0_i32 = arith.constant 0 : i32
    %c0_i32_0 = arith.constant 0 : i32
    return %arg0, %c0_i32 : i32, i32
  }
}

</mosaic_0001>

<bundles_post_ra>
// kernel: tpu_custom_call.1
= control target key start
LH: loop header
LB: loop body
LE: loop exit
PB: predicated region body
PF: predicated region fallthrough
CT: control target
= control target key end

     0   :  { %8 = vsyncpa [#allocation3], 0  ;;  %s273_s0 = inlined_call_operand.hbm [shape: f32[8,128], index: 0, kind: input, shape index: {}]   ;;  %s274_s1 = inlined_call_operand.hbm [shape: f32[8,128], index: 1, kind: input, shape index: {}]   ;;  %s275_s2 = inlined_call_operand.hbm [shape: f32[8,128], index: 2, kind: input, shape index: {}]   ;;  %s276_s3 = inlined_call_operand.hbm [shape: f32[1,1], index: 3, kind: output, shape index: {}]  }
   0x1   :  { %9 = vsyncpa [#allocation6], 0 }
   0x2   :  { %10 = vsyncpa [#allocation4], 0  ;;  %s201_s12 = smov [#allocation5]   ;;  %s202_s14 = smov [#allocation2]  }
   0x3   :  { %s33_s13 = sshll.u32 %s201_s12, 4  ;;  %s20_s15 = sshll.u32 %s202_s14, 4  ;;  %s34_s13 = int_to_ptr.vmem [resolvable:$true] %s33_s13  ;;  %s21_s15 = int_to_ptr.vmem [resolvable:$true] %s20_s15 }
   0x4   :  { %s119_s18 = scalar_lea.hbm %s274_s1, 128 }
   0x5   :  { %p120_p0 = scmp.ne.s32.totalorder %s274_s1, %s119_s18  ;;  %p123_p1 = scmp.lt.u32.totalorder %s119_s18, %s274_s1 }
   0x7   :  { %p125_p2 = pnand %p123_p1, %p120_p0 }
   0x9   :  { %128 = shalt.err (!%p125_p2)
}
   0xa   :  { %s129_s23 = scalar_lea.vmem %s34_s13, 128  ;;  %p134_p4 = scmp.lt.s32.totalorder %s34_s13, %s34_s13 }
   0xb   :  { %p130_p3 = scmp.ne.s32.totalorder %s34_s13, %s129_s23  ;;  %p135_p5 = scmp.lt.s32.totalorder %s129_s23, %s129_s23 }
   0xd   :  { %p136_p6 = por %p135_p5, %p134_p4 }
   0xf   :  { %p137_p7 = pnand %p136_p6, %p130_p3 }
  0x11   :  { %140 = shalt.err (!%p137_p7)
}
  0x12   :  { %36 = dma.hbm_to_vmem [thread:$0]  %s274_s1, 128, %s34_s13, [#allocation6]  }
  0x13   :  { %s141_s28 = scalar_lea.hbm %s273_s0, 128 }
  0x14   :  { %p142_p8 = scmp.ne.s32.totalorder %s273_s0, %s141_s28  ;;  %p145_p9 = scmp.lt.u32.totalorder %s141_s28, %s273_s0 }
  0x16   :  { %p147_p10 = pnand %p145_p9, %p142_p8 }
  0x18   :  { %150 = shalt.err (!%p147_p10)
}
  0x19   :  { %s151_s6 = scalar_lea.vmem %s21_s15, 128  ;;  %p156_p12 = scmp.lt.s32.totalorder %s21_s15, %s21_s15 }
  0x1a   :  { %p152_p11 = scmp.ne.s32.totalorder %s21_s15, %s151_s6  ;;  %p157_p13 = scmp.lt.s32.totalorder %s151_s6, %s151_s6 }
  0x1c   :  { %p158_p0 = por %p157_p13, %p156_p12 }
  0x1e   :  { %p159_p1 = pnand %p158_p0, %p152_p11 }
  0x20   :  { %162 = shalt.err (!%p159_p1)
}
  0x21   :  { %23 = dma.hbm_to_vmem [thread:$0]  %s273_s0, 128, %s21_s15, [#allocation3]  }
  0x22   :  { %s203_s8 = smov [#allocation7]   ;;  %s163_s12 = scalar_lea.hbm %s275_s2, 128 }
  0x23   :  { %s46_s9 = sshll.u32 %s203_s8, 4  ;;  %p164_p2 = scmp.ne.s32.totalorder %s275_s2, %s163_s12  ;;  %s47_s9 = int_to_ptr.vmem [resolvable:$true] %s46_s9 }
  0x24   :  { %p167_p3 = scmp.lt.u32.totalorder %s163_s12, %s275_s2 }
  0x26   :  { %p169_p4 = pnand %p167_p3, %p164_p2 }
  0x28   :  { %172 = shalt.err (!%p169_p4)
}
  0x29   :  { %s173_s18 = scalar_lea.vmem %s47_s9, 128  ;;  %p178_p6 = scmp.lt.s32.totalorder %s47_s9, %s47_s9 }
  0x2a   :  { %p174_p5 = scmp.ne.s32.totalorder %s47_s9, %s173_s18  ;;  %p179_p7 = scmp.lt.s32.totalorder %s173_s18, %s173_s18 }
  0x2c   :  { %p180_p8 = por %p179_p7, %p178_p6 }
  0x2e   :  { %p181_p9 = pnand %p180_p8, %p174_p5 }
  0x30   :  { %184 = shalt.err (!%p181_p9)
}
  0x31   :  { %49 = dma.hbm_to_vmem [thread:$0]  %s275_s2, 128, %s47_s9, [#allocation6]  }
  0x32   :  { %195 = dma.done.wait [#allocation3], 128  }
  0x33   :  { %196 = vsyncadd [#allocation3], 4294967168 }
  0x34   :  { %197 = dma.done.wait [#allocation6], 256  }
  0x35   :  { %198 = vsyncadd [#allocation6], 4294967040  ;;  %v70_v0 = vld [vmem:[#allocation7] sm:$0xff]  ;;  %v68_v1 = vld [vmem:[#allocation2] sm:$0xff]  ;;  %vm81_vm0 = vcmask 7168   ;;  %s185_s21 = scalar_lea.hbm %s276_s3, 16 }
  0x36   :  { %v69_v2 = vld [vmem:[#allocation5] sm:$0xff]  ;;  %76 = vadd.xlane.f32.xlu0 %v70_v0  ;;  %p186_p10 = scmp.ne.s32.totalorder %s276_s3, %s185_s21  ;;  %p189_p11 = scmp.lt.u32.totalorder %s185_s21, %s276_s3 }
  0x37   :  { %v71_v3 = vsub.f32 %v68_v1, %v69_v2 }
  0x38   :  { %p191_p12 = pnand %p189_p11, %p186_p10 }
  0x39   :  { %v72_v4 = vand.u32 2147483647, %v71_v3 }
  0x3b   :  { %v73_v5 = vmul.f32 %v72_v4, %v70_v0 }
  0x3d   :  { %74 = vadd.xlane.f32.xlu0 %v73_v5 }
  0xc3   :  { %v77_v6 = vpop.xlane.xlu0 %76 }
  0xc4   :  { %117 = vrcp.f32 %v77_v6 }
  0xca   :  { %v75_v7 = vpop.xlane.xlu0 %74 }
  0xce   :  { %v118_v8 = vpop.eup %117 }
  0xcf   :  { %v79_v9 = vmul.f32 %v118_v8, %v75_v7 }
  0xd1   :  { %v82_v10 = vsel %vm81_vm0, %v79_v9, 0.0 }
  0xd2   :  { %83 = vadd.xlane.f32.xlu1 %v82_v10 }
 0x15f   :  { %v84_v11 = vpop.xlane.xlu1 %83 }
 0x160   :  { %v85_v12 = vrot.slane %v84_v11, 4 }
 0x162   :  { %v86_v13 = vadd.f32 %v85_v12, %v84_v11 }
 0x164   :  { %v87_v14 = vrot.slane %v86_v13, 2 }
 0x166   :  { %v88_v15 = vadd.f32 %v87_v14, %v86_v13 }
 0x168   :  { %v89_v16 = vrot.slane %v88_v15, 1 }
 0x16a   :  { %v90_v17 = vadd.f32 %v89_v16, %v88_v15 }
 0x16c   :  { %110 = vpush %v90_v17 }
 0x19d   :  { %s111_s2 = spop %110 }
 0x19e   :  { %94 = sst [smem:[#allocation8]] %s111_s2 }
 0x19f   :  { %194 = shalt.err (!%p191_p12)
}
 0x1a0   :  { %s204_s26 = smov [#allocation8]  }
 0x1a1   :  { %102 = dma.smem_to_hbm %s204_s26, 16, %s276_s3, [#allocation4]  }
 0x1a2   :  { %199 = dma.done.wait [#allocation4], 16  }
 0x1a3   :  { %200 = vsyncadd [#allocation4], 4294967280 }
 0x1a4   :  { %106 = sfence }
 0x1a5   :  { %107 = vsyncpa [#allocation3], 1 }
 0x1a6   :  { %108 = vsyncpa [#allocation6], 1 }
 0x1a7   :  { %109 = vsyncpa [#allocation4], 1 }

</bundles_post_ra>
